<compile_context>
chip_gen: v5e
topology: v5e:2x2
jax: 0.10.0
libtpu: 0.0.40
codegen_flags: <defaults>
</compile_context>

<pallas_src>
import jax
import jax.numpy as jnp
from jax.experimental import pallas as pl
from jax.experimental.pallas import tpu as pltpu


LANE = 128        # TPU lane width: pad feature dims to multiples of this
MAX_TM = 2048     # upper cap on the batch tile (clean MXU M-tiles, bounded VMEM)


def _round_up(n, m):
    return ((n + m - 1) // m) * m


def _vmem_capacity_bytes():
    """Physical VMEM per TensorCore (128 MiB v5e/v6e, 64 MiB v7x)."""
    try:
        return int(pltpu.get_tpu_info().vmem_capacity_bytes)
    except Exception:
        return 64 * 1024 * 1024  # v7x size: a safe lower bound on every gen


def mynet_kernel(x_ref, w1_ref, b1_ref, w2_ref, b2_ref, w3_ref, b3_ref, o_ref):
    # Streaming x tile arrives in f32; cast to bf16 in-kernel for the MXU
    # (avoids a wrapper-side HBM repack pass over the activations).
    x = x_ref[...].astype(jnp.bfloat16)

    # input_layer: x @ W1 + b1   (bf16 operands, f32 accumulation)
    h = jnp.dot(x, w1_ref[...], preferred_element_type=jnp.float32)
    h = h + b1_ref[...]

    # hidden_layer: h @ W2 + b2
    h = jnp.dot(h.astype(jnp.bfloat16), w2_ref[...],
                preferred_element_type=jnp.float32)
    h = h + b2_ref[...]

    # ReLU (f32 on the VPU)
    h = jnp.maximum(h, 0.0)

    # output_layer: h @ W3 + b3
    h = jnp.dot(h.astype(jnp.bfloat16), w3_ref[...],
                preferred_element_type=jnp.float32)
    h = h + b3_ref[...]

    # Sigmoid (stable form; exp runs on the otherwise-idle EUP)
    o_ref[...] = jax.nn.sigmoid(h).astype(o_ref.dtype)


def mynet_forward(x, params, *, out_dtype=jnp.float32):
    """Fused MLP forward. Tiles the batch; weights stay resident in VMEM."""
    w1, b1, w2, b2, w3, b3 = params
    batch, input_size = x.shape
    hidden_size = w1.shape[1]
    output_size = w3.shape[1]

    # Feature-dim padding for lane-dense weights / output.  x's feature dim is
    # left unpadded: block (tm, input_size) is legal because the last block
    # dim equals the full array dim, and w1's contraction dim matches it.
    hid_p = _round_up(hidden_size, LANE)
    out_p = _round_up(output_size, LANE)

    # --- per-generation VMEM budget -> vmem_limit_bytes and batch tile ------
    vmem_cap = _vmem_capacity_bytes()
    vmem_limit = min((vmem_cap * 3) // 4, 112 * 1024 * 1024)

    x_bytes = jnp.dtype(x.dtype).itemsize
    out_bytes = jnp.dtype(out_dtype).itemsize

    # Resident (single-buffered) weights in bf16 + biases in f32.
    weight_bytes = 2 * (input_size * hid_p + hid_p * hid_p + hid_p * out_p)
    weight_bytes += 4 * (hid_p + hid_p + out_p)
    # TODO(synk): if weight_bytes alone exceeds the v7x budget (hid_p >= ~4096
    # single-buffered), fall back to K-tiling the hidden matmul with a grid
    # axis + f32 accumulator instead of whole-w2 residency.

    # Per-row streaming cost: double-buffered x and out tiles plus ~3 f32
    # (tm, hid_p) intermediates live inside the kernel body.
    per_row = 2 * input_size * x_bytes + 2 * out_p * out_bytes + 3 * hid_p * 4
    headroom = 4 * 1024 * 1024
    avail = max(vmem_limit - weight_bytes - headroom, 0)
    tm_budget = max(avail // max(per_row, 1), 8)

    tm = min(int(tm_budget), MAX_TM, _round_up(batch, 8))
    if batch > 8:
        # Guarantee >= 2 grid steps so the "parallel" batch axis actually
        # lands on both TensorCores on v7x megacore.
        tm = min(tm, _round_up((batch + 1) // 2, 8))
    tm = max(8, (tm // 8) * 8)

    batch_p = _round_up(batch, tm)

    # --- prepare operands ----------------------------------------------------
    def pad2(a, rows, cols, dtype):
        a = a.astype(dtype)
        return jnp.pad(a, ((0, rows - a.shape[0]), (0, cols - a.shape[1])))

    x_p = x
    if batch_p != batch:
        x_p = jnp.pad(x_p, ((0, batch_p - batch), (0, 0)))

    w1_p = pad2(w1, input_size, hid_p, jnp.bfloat16)
    w2_p = pad2(w2, hid_p, hid_p, jnp.bfloat16)
    w3_p = pad2(w3, hid_p, out_p, jnp.bfloat16)
    b1_p = pad2(b1, 1, hid_p, jnp.float32)
    b2_p = pad2(b2, 1, hid_p, jnp.float32)
    b3_p = pad2(b3, 1, out_p, jnp.float32)

    grid = (batch_p // tm,)

    # Weights & biases: constant block index (fetched once, stay resident) and
    # single-buffered so they don't pay a 2x VMEM footprint.
    def resident(shape):
        return pl.BlockSpec(shape, lambda i: (0, 0),
                            pipeline_mode=pl.Buffered(1))

    # x / out march along the batch with the default double-buffered pipeline.
    # (If the x DMA is still exposed at large scale, bump these to Buffered(3).)
    out_padded = pl.pallas_call(
        mynet_kernel,
        out_shape=jax.ShapeDtypeStruct((batch_p, out_p), out_dtype),
        grid=grid,
        in_specs=[
            pl.BlockSpec((tm, input_size), lambda i: (i, 0)),   # x tile (f32)
            resident((input_size, hid_p)),                      # w1
            resident((1, hid_p)),                               # b1
            resident((hid_p, hid_p)),                           # w2
            resident((1, hid_p)),                               # b2
            resident((hid_p, out_p)),                           # w3
            resident((1, out_p)),                               # b3
        ],
        out_specs=pl.BlockSpec((tm, out_p), lambda i: (i, 0)),
        compiler_params=pltpu.CompilerParams(
            dimension_semantics=("parallel",),   # megacore sharding on v7x
            vmem_limit_bytes=int(vmem_limit),
        ),
    )(x_p, w1_p, b1_p, w2_p, b2_p, w3_p, b3_p)

    # strip batch / lane padding
    return out_padded[:batch, :output_size]


def init_params(key, input_size, hidden_size, output_size):
    """Deterministic PyTorch-style (uniform +/- 1/sqrt(fan_in)) init, f32."""
    ks = jax.random.split(key, 6)

    def linear(kw, kb, fan_in, fan_out):
        bound = 1.0 / jnp.sqrt(fan_in)
        w = jax.random.uniform(kw, (fan_in, fan_out), jnp.float32, -bound, bound)
        b = jax.random.uniform(kb, (1, fan_out), jnp.float32, -bound, bound)
        return w, b

    w1, b1 = linear(ks[0], ks[1], input_size, hidden_size)
    w2, b2 = linear(ks[2], ks[3], hidden_size, hidden_size)
    w3, b3 = linear(ks[4], ks[5], hidden_size, output_size)
    return (w1, b1, w2, b2, w3, b3)


def mynet_reference(x, params):
    """Pure-JAX f32 reference for correctness check."""
    w1, b1, w2, b2, w3, b3 = params
    h = x @ w1 + b1
    h = h @ w2 + b2
    h = jnp.maximum(h, 0.0)
    h = h @ w3 + b3
    return jax.nn.sigmoid(h)


if __name__ == "__main__":
    # Small shapes consistent with the module's forward.
    batch, input_size, hidden_size, output_size = 8, 16, 32, 8

    key = jax.random.PRNGKey(0)
    k_x, k_p = jax.random.split(key)
    x = jax.random.normal(k_x, (batch, input_size), jnp.float32)
    params = init_params(k_p, input_size, hidden_size, output_size)

    out = mynet_forward(x, params)
    out = jax.block_until_ready(out)

    ref = mynet_reference(x, params)
    assert out.shape == (batch, output_size)
    # bf16 matmul operands -> slightly looser tolerance than pure f32.
    assert jnp.allclose(out, ref, atol=1e-2, rtol=1e-2), "mismatch vs reference"

    print("KERNEL_OK")
</pallas_src>

<mosaic_0001>
module attributes {stable_mosaic.version = 11 : i64} {
  func.func @mynet_kernel(%arg0: i32, %arg1: memref<8x16xf32, #tpu.memory_space<vmem>>, %arg2: memref<16x128xbf16, #tpu.memory_space<vmem>>, %arg3: memref<1x128xf32, #tpu.memory_space<vmem>>, %arg4: memref<128x128xbf16, #tpu.memory_space<vmem>>, %arg5: memref<1x128xf32, #tpu.memory_space<vmem>>, %arg6: memref<128x128xbf16, #tpu.memory_space<vmem>>, %arg7: memref<1x128xf32, #tpu.memory_space<vmem>>, %arg8: memref<8x128xf32, #tpu.memory_space<vmem>>) attributes {dimension_semantics = [#tpu.dimension_semantics<parallel>], iteration_bounds = array<i64: 1>, scalar_prefetch = 0 : i64, scratch_operands = 0 : i64, tpu.core_type = #tpu.core_type<tc>, window_params = [{transform_indices = @transform_0, window_bounds = array<i64: 8, 16>}, {pipeline_mode = #tpu.pipeline_mode<synchronous>, transform_indices = @transform_1, window_bounds = array<i64: 16, 128>}, {pipeline_mode = #tpu.pipeline_mode<synchronous>, transform_indices = @transform_2, window_bounds = array<i64: 1, 128>}, {pipeline_mode = #tpu.pipeline_mode<synchronous>, transform_indices = @transform_3, window_bounds = array<i64: 128, 128>}, {pipeline_mode = #tpu.pipeline_mode<synchronous>, transform_indices = @transform_4, window_bounds = array<i64: 1, 128>}, {pipeline_mode = #tpu.pipeline_mode<synchronous>, transform_indices = @transform_5, window_bounds = array<i64: 128, 128>}, {pipeline_mode = #tpu.pipeline_mode<synchronous>, transform_indices = @transform_6, window_bounds = array<i64: 1, 128>}, {transform_indices = @transform_7, window_bounds = array<i64: 8, 128>}]} {
    %c0 = arith.constant 0 : index
    %c0_0 = arith.constant 0 : index
    %0 = vector.load %arg1[%c0, %c0_0] : memref<8x16xf32, #tpu.memory_space<vmem>>, vector<8x16xf32>
    %1 = arith.truncf %0 : vector<8x16xf32> to vector<8x16xbf16>
    %c0_1 = arith.constant 0 : index
    %c0_2 = arith.constant 0 : index
    %2 = vector.load %arg2[%c0_1, %c0_2] : memref<16x128xbf16, #tpu.memory_space<vmem>>, vector<16x128xbf16>
    %cst = arith.constant dense<0.000000e+00> : vector<8x128xf32>
    %3 = tpu.matmul %1, %2, %cst {dimension_numbers = #tpu.dot_dimension_numbers<[1], [0], [0], [1], [0, 0, 1, 1], [], []>} : vector<8x16xbf16>, vector<16x128xbf16>, vector<8x128xf32> -> vector<8x128xf32>
    %c0_3 = arith.constant 0 : index
    %c0_4 = arith.constant 0 : index
    %4 = vector.load %arg3[%c0_3, %c0_4] : memref<1x128xf32, #tpu.memory_space<vmem>>, vector<1x128xf32>
    %5 = vector.broadcast %4 : vector<1x128xf32> to vector<8x128xf32>
    %6 = arith.addf %3, %5 : vector<8x128xf32>
    %7 = arith.truncf %6 : vector<8x128xf32> to vector<8x128xbf16>
    %c0_5 = arith.constant 0 : index
    %c0_6 = arith.constant 0 : index
    %8 = vector.load %arg4[%c0_5, %c0_6] : memref<128x128xbf16, #tpu.memory_space<vmem>>, vector<128x128xbf16>
    %cst_7 = arith.constant dense<0.000000e+00> : vector<8x128xf32>
    %9 = tpu.matmul %7, %8, %cst_7 {dimension_numbers = #tpu.dot_dimension_numbers<[1], [0], [0], [1], [0, 0, 1, 1], [], []>} : vector<8x128xbf16>, vector<128x128xbf16>, vector<8x128xf32> -> vector<8x128xf32>
    %c0_8 = arith.constant 0 : index
    %c0_9 = arith.constant 0 : index
    %10 = vector.load %arg5[%c0_8, %c0_9] : memref<1x128xf32, #tpu.memory_space<vmem>>, vector<1x128xf32>
    %11 = vector.broadcast %10 : vector<1x128xf32> to vector<8x128xf32>
    %12 = arith.addf %9, %11 : vector<8x128xf32>
    %cst_10 = arith.constant 0.000000e+00 : f32
    %13 = vector.broadcast %cst_10 : f32 to vector<8x128xf32>
    %14 = arith.maximumf %12, %13 : vector<8x128xf32>
    %15 = arith.truncf %14 : vector<8x128xf32> to vector<8x128xbf16>
    %c0_11 = arith.constant 0 : index
    %c0_12 = arith.constant 0 : index
    %16 = vector.load %arg6[%c0_11, %c0_12] : memref<128x128xbf16, #tpu.memory_space<vmem>>, vector<128x128xbf16>
    %cst_13 = arith.constant dense<0.000000e+00> : vector<8x128xf32>
    %17 = tpu.matmul %15, %16, %cst_13 {dimension_numbers = #tpu.dot_dimension_numbers<[1], [0], [0], [1], [0, 0, 1, 1], [], []>} : vector<8x128xbf16>, vector<128x128xbf16>, vector<8x128xf32> -> vector<8x128xf32>
    %c0_14 = arith.constant 0 : index
    %c0_15 = arith.constant 0 : index
    %18 = vector.load %arg7[%c0_14, %c0_15] : memref<1x128xf32, #tpu.memory_space<vmem>>, vector<1x128xf32>
    %19 = vector.broadcast %18 : vector<1x128xf32> to vector<8x128xf32>
    %20 = arith.addf %17, %19 : vector<8x128xf32>
    %21 = arith.negf %20 : vector<8x128xf32>
    %22 = math.exp %21 : vector<8x128xf32>
    %cst_16 = arith.constant 1.000000e+00 : f32
    %23 = vector.broadcast %cst_16 : f32 to vector<8x128xf32>
    %24 = arith.addf %23, %22 : vector<8x128xf32>
    %25 = arith.divf %23, %24 : vector<8x128xf32>
    %c0_17 = arith.constant 0 : index
    %c0_18 = arith.constant 0 : index
    %26 = vector.load %arg8[%c0_17, %c0_18] : memref<8x128xf32, #tpu.memory_space<vmem>>, vector<8x128xf32>
    tpu.vector_store %arg8[%c0_17, %c0_18], %25 {strides = array<i32>} : memref<8x128xf32, #tpu.memory_space<vmem>>, vector<8x128xf32>,
    return
  }
  func.func @transform_0(%arg0: i32) -> (i32, i32) {
    %c0_i32 = arith.constant 0 : i32
    %c0_i32_0 = arith.constant 0 : i32
    return %arg0, %c0_i32 : i32, i32
  }
  func.func @transform_1(%arg0: i32) -> (i32, i32) {
    %c0_i32 = arith.constant 0 : i32
    %c0_i32_0 = arith.constant 0 : i32
    %c0_i32_1 = arith.constant 0 : i32
    return %c0_i32, %c0_i32_0 : i32, i32
  }
  func.func @transform_2(%arg0: i32) -> (i32, i32) {
    %c0_i32 = arith.constant 0 : i32
    %c0_i32_0 = arith.constant 0 : i32
    %c0_i32_1 = arith.constant 0 : i32
    return %c0_i32, %c0_i32_0 : i32, i32
  }
  func.func @transform_3(%arg0: i32) -> (i32, i32) {
    %c0_i32 = arith.constant 0 : i32
    %c0_i32_0 = arith.constant 0 : i32
    %c0_i32_1 = arith.constant 0 : i32
    return %c0_i32, %c0_i32_0 : i32, i32
  }
  func.func @transform_4(%arg0: i32) -> (i32, i32) {
    %c0_i32 = arith.constant 0 : i32
    %c0_i32_0 = arith.constant 0 : i32
    %c0_i32_1 = arith.constant 0 : i32
    return %c0_i32, %c0_i32_0 : i32, i32
  }
  func.func @transform_5(%arg0: i32) -> (i32, i32) {
    %c0_i32 = arith.constant 0 : i32
    %c0_i32_0 = arith.constant 0 : i32
    %c0_i32_1 = arith.constant 0 : i32
    return %c0_i32, %c0_i32_0 : i32, i32
  }
  func.func @transform_6(%arg0: i32) -> (i32, i32) {
    %c0_i32 = arith.constant 0 : i32
    %c0_i32_0 = arith.constant 0 : i32
    %c0_i32_1 = arith.constant 0 : i32
    return %c0_i32, %c0_i32_0 : i32, i32
  }
  func.func @transform_7(%arg0: i32) -> (i32, i32) {
    %c0_i32 = arith.constant 0 : i32
    %c0_i32_0 = arith.constant 0 : i32
    return %arg0, %c0_i32 : i32, i32
  }
}

</mosaic_0001>

<bundles_post_ra>
// kernel: tpu_custom_call.1
= control target key start
LH: loop header
LB: loop body
LE: loop exit
PB: predicated region body
PF: predicated region fallthrough
CT: control target
= control target key end

     0   :  { %12 = vsyncpa [#allocation3], 0  ;;  %s624_s0 = inlined_call_operand.hbm [shape: f32[8,16], index: 0, kind: input, shape index: {}]   ;;  %s625_s1 = inlined_call_operand.hbm [shape: bf16[16,128], index: 1, kind: input, shape index: {}]   ;;  %s626_s2 = inlined_call_operand.vmem [shape: f32[1,128], index: 2, kind: input, shape index: {}]   ;;  %s627_s3 = inlined_call_operand.hbm [shape: bf16[128,128], index: 3, kind: input, shape index: {}]   ;;  %s628_s4 = inlined_call_operand.vmem [shape: f32[1,128], index: 4, kind: input, shape index: {}]   ;;  %s629_s5 = inlined_call_operand.hbm [shape: bf16[128,128], index: 5, kind: input, shape index: {}]   ;;  %s630_s6 = inlined_call_operand.vmem [shape: f32[1,128], index: 6, kind: input, shape index: {}]   ;;  %s631_s7 = inlined_call_operand.hbm [shape: f32[8,128], index: 7, kind: output, shape index: {}]  }
   0x1   :  { %13 = vsyncpa [#allocation6], 0 }
   0x2   :  { %14 = vsyncpa [#allocation9], 0  ;;  %s31_s26 = sshll.u32 %s625_s1, 4  ;;  %s32_s26 = int_to_ptr.hbm [resolvable:$true] %s31_s26 }
   0x3   :  { %15 = vsyncpa [#allocation4], 0  ;;  %s553_s27 = smov [#allocation5]   ;;  %s21_s8 = sshll.u32 %s624_s0, 4  ;;  %s22_s8 = int_to_ptr.hbm [resolvable:$true] %s21_s8 }
   0x4   :  { %s33_s28 = sshll.u32 %s553_s27, 4  ;;  %s554_s9 = smov 64   ;;  %s34_s28 = int_to_ptr.vmem [resolvable:$true] %s33_s28 }
   0x5   :  { %s555_s10 = smov 4   ;;  %s556_s11 = smov [#allocation2]  }
   0x6   :  { %39 = dma.hbm_to_vmem [thread:$0]  %s32_s26, 128, %s34_s28, [#allocation6], %s554_s9, %s554_s9, %s555_s10  }
   0x7   :  { %s23_s12 = sshll.u32 %s556_s11, 4  ;;  %s46_s15 = sshll.u32 %s627_s3, 4  ;;  %s24_s12 = int_to_ptr.vmem [resolvable:$true] %s23_s12  ;;  %s47_s15 = int_to_ptr.hbm [resolvable:$true] %s46_s15 }
   0x8   :  { %26 = dma.hbm_to_vmem [thread:$0]  %s22_s8, 128, %s24_s12, [#allocation3]  }
   0x9   :  { %s61_s17 = sshll.u32 %s629_s5, 4  ;;  %s557_s18 = smov [#allocation7]   ;;  %s62_s17 = int_to_ptr.hbm [resolvable:$true] %s61_s17 }
   0xa   :  { %s48_s19 = sshll.u32 %s557_s18, 4  ;;  %s558_s0 = smov [#allocation8]   ;;  %s49_s19 = int_to_ptr.vmem [resolvable:$true] %s48_s19 }
   0xb   :  { %54 = dma.hbm_to_vmem [thread:$0]  %s47_s15, 1024, %s49_s19, [#allocation6], %s554_s9, %s554_s9, %s555_s10  }
   0xc   :  { %s63_s20 = sshll.u32 %s558_s0, 4  ;;  %s64_s20 = int_to_ptr.vmem [resolvable:$true] %s63_s20 }
   0xd   :  { %69 = dma.hbm_to_vmem [thread:$0]  %s62_s17, 1024, %s64_s20, [#allocation9], %s554_s9, %s554_s9, %s555_s10  }
   0xe   :  { %545 = dma.done.wait [#allocation3], 128  }
   0xf   :  { %546 = vsyncadd [#allocation3], 4294967168 }
  0x10   :  { %547 = dma.done.wait [#allocation6], 1152  }
  0x11   :  { %548 = vsyncadd [#allocation6], 4294966144 }
  0x12   :  { %549 = dma.done.wait [#allocation9], 1024  }
  0x13   :  { %550 = vsyncadd [#allocation9], 4294966272  ;;  %v394_v0 = vld [vmem:[#allocation5] sm:$0xff]  ;;  %v89_v1 = vld [vmem:[#allocation2] sm:$0xff]  ;;  %vm103_vm0 = vcmask 130048  }
  0x14   :  { %v402_v2 = vld [vmem:[#allocation7 + $0x38] sm:$0xff]  ;;  %v90_v3 = vpack.c.bf16 %v89_v1, %v89_v1  ;;  %114 = vmatpush.bf16.msra.mxu0 %v394_v0  ;;  %v401_v4 = vld [vmem:[#allocation7 + $0x30] sm:$0xff]  ;;  %v400_v5 = vld [vmem:[#allocation7 + $0x28] sm:$0xff] }
  0x15   :  { %189 = vmatpush.bf16.msra.mxu1 %v402_v2  ;;  %v399_v6 = vld [vmem:[#allocation7 + $0x20] sm:$0xff]  ;;  %v398_v7 = vld [vmem:[#allocation7 + $0x18] sm:$0xff]  ;;  %v397_v8 = vld [vmem:[#allocation7 + $0x10] sm:$0xff] }
  0x16   :  { %v396_v9 = vld [vmem:[#allocation7 + $0x8] sm:$0xff]  ;;  %v395_v10 = vld [vmem:[#allocation7] sm:$0xff]  ;;  %v410_v11 = vld [vmem:[#allocation8 + $0x38] sm:$0xff] }
  0x17   :  { %328 = vmatmul.msk.bf16.vlgmr.msra.gmra.mxu0 %vm103_vm0, %v90_v3  ;;  %272 = vmatpush.bf16.msra.mxu2 %v410_v11  ;;  %v409_v12 = vld [vmem:[#allocation8 + $0x30] sm:$0xff]  ;;  %v408_v13 = vld [vmem:[#allocation8 + $0x28] sm:$0xff]  ;;  %v407_v14 = vld [vmem:[#allocation8 + $0x20] sm:$0xff] }
  0x18   :  { %v406_v15 = vld [vmem:[#allocation8 + $0x18] sm:$0xff]  ;;  %v405_v16 = vld [vmem:[#allocation8 + $0x10] sm:$0xff]  ;;  %v404_v22 = vld [vmem:[#allocation8 + $0x8] sm:$0xff] }
  0x19   :  { %190 = vmatpush.bf16.msra.mxu1 %v401_v4  ;;  %v418_v17 = vld [vmem:[%s626_s2] ss:$0 sm:$0xff]  ;;  %v403_v23 = vld [vmem:[#allocation8] sm:$0xff] }
  0x1a   :  { %v419_v24 = vld [vmem:[%s628_s4] ss:$0 sm:$0xff]  ;;  %s559_s4 = smov [#allocation10]  }
  0x1b   :  { %273 = vmatpush.bf16.msra.mxu2 %v409_v12  ;;  %v420_v30 = vld [vmem:[%s630_s6] ss:$0 sm:$0xff]  ;;  %s310_s24 = sshll.u32 %s559_s4, 4  ;;  %s312_s6 = sshll.u32 %s631_s7, 4  ;;  %s311_s24 = int_to_ptr.vmem [resolvable:$true] %s310_s24  ;;  %s313_s6 = int_to_ptr.hbm [resolvable:$true] %s312_s6 }
  0x1d   :  { %191 = vmatpush.bf16.msra.mxu1 %v400_v5 }
  0x1f   :  { %274 = vmatpush.bf16.msra.mxu2 %v408_v13 }
  0x21   :  { %192 = vmatpush.bf16.msra.mxu1 %v399_v6 }
  0x23   :  { %275 = vmatpush.bf16.msra.mxu2 %v407_v14 }
  0x25   :  { %193 = vmatpush.bf16.msra.mxu1 %v398_v7 }
  0x27   :  { %276 = vmatpush.bf16.msra.mxu2 %v406_v15 }
  0x29   :  { %194 = vmatpush.bf16.msra.mxu1 %v397_v8 }
  0x2b   :  { %277 = vmatpush.bf16.msra.mxu2 %v405_v16 }
  0x2d   :  { %195 = vmatpush.bf16.msra.mxu1 %v396_v9 }
  0x2f   :  { %278 = vmatpush.bf16.msra.mxu2 %v404_v22 }
  0x31   :  { %196 = vmatpush.bf16.msra.mxu1 %v395_v10 }
  0x33   :  { %279 = vmatpush.bf16.msra.mxu2 %v403_v23 }
  0x94   :  { %v116_v18 = vpop.f32.mrf.mxu0 }
  0x95   :  { %v117_v19 = vadd.f32 %v418_v17, %v116_v18 }
  0x97   :  { %v120_v20 = vpack.c.bf16 %v117_v19, %v117_v19 }
  0x99   :  { %197 = vmatmul.bf16.vlgmr.msra.gmra.mxu1 %v120_v20 }
  0x9c   :  { %v118_v21 = vpop.f32.mrf.mxu0 }
 0x116   :  { %v198_v25 = vpop.f32.mrf.mxu1 }
 0x117   :  { %v199_v26 = vadd.f32 %v419_v24, %v198_v25 }
 0x119   :  { %v202_v27 = vmax.f32 %v199_v26, 0.0 }
 0x11b   :  { %v203_v28 = vpack.c.bf16 %v202_v27, %v202_v27 }
 0x11d   :  { %280 = vmatmul.bf16.vlgmr.msra.gmra.mxu2 %v203_v28 }
 0x11e   :  { %v200_v29 = vpop.f32.mrf.mxu1 }
 0x1a0   :  { %v281_v31 = vpop.f32.mrf.mxu2 }
 0x1a1   :  { %v282_v32 = vadd.f32 %v420_v30, %v281_v31 }
 0x1a3   :  { %v393_v33 = vmul.f32 -1.442695, %v282_v32 }
 0x1a5   :  { %421 = vpow2.f32 %v393_v33 }
 0x1a8   :  { %v283_v34 = vpop.f32.mrf.mxu2 }
 0x1ab   :  { %v422_v35 = vpop.eup %421 }
 0x1ac   :  { %v288_v36 = vadd.f32 1.0, %v422_v35 }
 0x1ae   :  { %423 = vrcp.f32 %v288_v36  ;;  %v300_v40 = vand.u32 2147483648, %v288_v36  ;;  %v298_v42 = vand.u32 2147483647, %v288_v36  ;;  %vm294_vm2 = vweird.f32 %v288_v36 }
 0x1b0   :  { %v301_v44 = vor.u32 1.1754944e-38, %v300_v40  ;;  %vm299_vm4 = vcmp.eq.f32.partialorder %v298_v42, 8.507059e+37 }
 0x1b4   :  { %v424_v37 = vpop.eup %423 }
 0x1b5   :  { %v290_v38 = vmul.f32 %v424_v37, %v288_v36  ;;  %vm295_vm1 = vweird.f32 %v424_v37 }
 0x1b6   :  { %vm296_vm3 = vmor %vm294_vm2, %vm295_vm1 }
 0x1b7   :  { %v291_v39 = vsub.f32 1.0, %v290_v38 }
 0x1b9   :  { %v292_v41 = vmul.f32 %v424_v37, %v291_v39 }
 0x1bb   :  { %v293_v43 = vadd.f32 %v424_v37, %v292_v41 }
 0x1bd   :  { %v297_v45 = vsel %vm296_vm3, %v424_v37, %v293_v43 }
 0x1be   :  { %v302_v46 = vsel %vm299_vm4, %v301_v44, %v297_v45 }
 0x1bf   :  { %304 = vst [vmem:[#allocation10] sm:$0xff] %v302_v46 }
 0x1c0   :  { %315 = dma.vmem_to_hbm [thread:$0]  %s311_s24, 128, %s313_s6, [#allocation4]  }
 0x1c1   :  { %551 = dma.done.wait [#allocation4], 128  }
 0x1c2   :  { %552 = vsyncadd [#allocation4], 4294967168 }
 0x1c3   :  { %320 = vsyncpa [#allocation3], 1 }
 0x1c4   :  { %321 = vsyncpa [#allocation6], 1 }
 0x1c5   :  { %322 = vsyncpa [#allocation9], 1 }
 0x1c6   :  { %323 = vsyncpa [#allocation4], 1 }

</bundles_post_ra>
